<compile_context>
chip_gen: v6e
topology: v6e:2x2x1
jax: 0.10.0
libtpu: 0.0.40
codegen_flags: <defaults>
</compile_context>

<pallas_src>
import functools
import math

import jax
import jax.numpy as jnp
from jax import lax
from jax.experimental import pallas as pl
from jax.experimental.pallas import tpu as pltpu


def _vmem_capacity_bytes():
    """Best-effort physical VMEM per core; conservative fallback (v7x = 64 MiB)."""
    try:
        info = pltpu.get_tpu_info()
        for name in ("vmem_capacity_bytes", "vmem_size_bytes", "vmem_bytes"):
            v = getattr(info, name, None)
            if isinstance(v, int) and v > 0:
                return v
    except Exception:
        pass
    return 64 * 1024 * 1024


def _modconv_kernel(x_ref, w_ref, mod_ref, o_ref, scratch_ref, *,
                    K, C_in, Wrow, n_flat, use_im2col):
    """One (batch, C_out-tile) grid step.

    x_ref       : (1, C_in, Lflat)   bf16, whole padded flat image (resident per b)
    w_ref       : (TCO, K*K*C_in)    f32, weight tile with demod folded in
    mod_ref     : (1, 1, K*K*C_in)   f32, per-sample modulation (tiled over taps)
    o_ref       : (1, TCO, n_flat)   out dtype, lane-dense flat output slab
    scratch_ref : im2col RHS (K*K*C_in, n_flat) bf16   [use_im2col]
                  or f32 accumulator (TCO, n_flat)      [per-tap path]
    """
    # Fold the per-sample modulation into the tiny weight in f32 (demod was
    # already folded host-side, also in f32), then cast the MXU operand to bf16.
    wmod = (w_ref[...] * mod_ref[0, 0][None, :]).astype(jnp.bfloat16)  # (TCO, K*K*C_in)

    if use_im2col:
        # Build the im2col RHS once per batch sample: it does not depend on the
        # output-channel tile, and the VMEM scratch persists across grid steps.
        @pl.when(pl.program_id(1) == 0)
        def _():
            for ky in range(K):
                for kx in range(K):
                    tap = ky * K + kx
                    scratch_ref[pl.ds(tap * C_in, C_in), :] = (
                        x_ref[0, :, pl.ds(ky * Wrow + kx, n_flat)])
        # Single MXU matmul with contraction dim K*K*C_in (vs. K*K tiny passes).
        acc = jnp.dot(wmod, scratch_ref[...], preferred_element_type=jnp.float32)
        o_ref[0] = acc.astype(o_ref.dtype)
    else:
        # Per-tap matmuls accumulated into a VMEM f32 scratch so the live
        # accumulator never spans all K*K unrolled taps in vregs.
        for ky in range(K):
            for kx in range(K):
                tap = ky * K + kx
                rhs = x_ref[0, :, pl.ds(ky * Wrow + kx, n_flat)]      # (C_in, n_flat) bf16
                part = jnp.dot(wmod[:, tap * C_in:(tap + 1) * C_in], rhs,
                               preferred_element_type=jnp.float32)
                if tap == 0:
                    scratch_ref[...] = part
                else:
                    scratch_ref[...] += part
        o_ref[0] = scratch_ref[...].astype(o_ref.dtype)


def modulated_conv2d(x_nchw, style, weight, mod_w, mod_b, style_inv, *,
                     demodulate=True, out_dtype=jnp.bfloat16,
                     use_im2col=None, co_tile=None):
    """Forward pass matching the PyTorch ModulatedConv2d module.

    x_nchw : (B, C_in, H, W)       weight    : (C_out, C_in, K, K)
    style  : (B, style_dim)        mod_w     : (C_in, style_dim), mod_b: (C_in,)
    style_inv : (1, 1, C_in, 1, 1)
    returns (B, C_out, H, W) in `out_dtype` (bf16 by default).
    """
    B, C_in, H, W = x_nchw.shape
    C_out, _, K, _ = weight.shape
    scale = 1.0 / math.sqrt(C_in * K * K)
    p = K // 2                                   # 'same' for odd K (as in PyTorch)
    Hp, Wp = H + 2 * p, W + 2 * p
    KKC = K * K * C_in

    # Lane-friendly row stride: multiple of 16 so H*Wrow % 128 == 0 when H % 8 == 0.
    Wrow = ((Wp + 15) // 16) * 16
    n_flat = H * Wrow                            # flat output lanes per (b, co) step
    Lraw = Hp * Wrow + 2 * p                     # last flat input index touched + 1
    Lflat = ((Lraw + 127) // 128) * 128          # padded flat input length

    if use_im2col is None:
        use_im2col = C_in <= 128                 # per-tap contraction wastes MXU rows

    out_itemsize = jnp.dtype(out_dtype).itemsize
    vmem_cap = _vmem_capacity_bytes()
    budget = vmem_cap // 2
    vmem_limit = min(int(vmem_cap * 0.75), 100 * 1024 * 1024)

    input_bytes = 2 * C_in * Lflat * 2           # double-buffered bf16 image block
    im2col_bytes = KKC * n_flat * 2 if use_im2col else 0
    if input_bytes + im2col_bytes > budget:
        # TODO(synk): row-tiled manual-DMA (pl.ANY) variant for huge images.
        raise NotImplementedError(
            "padded image (+ im2col scratch) exceeds the VMEM budget; a "
            "row-tiled manual-DMA variant is required for this problem size")

    def _fits(tco):
        per = (2 * tco * n_flat * out_itemsize           # output block, double-buffered
               + 2 * (tco * KKC * 4 + KKC * 4)           # weight + mod blocks
               + tco * KKC * 2                           # folded bf16 weight temp
               + (0 if use_im2col else tco * n_flat * 4))  # f32 accumulator scratch
        return input_bytes + im2col_bytes + per <= budget

    if (co_tile is not None and C_out % co_tile == 0
            and (co_tile % 8 == 0 or co_tile == C_out)):
        TCO = co_tile
    else:
        cands = [d for d in range(C_out, 0, -1)
                 if C_out % d == 0 and (d % 8 == 0 or d == C_out)]
        TCO = next((d for d in cands if _fits(d)), cands[-1])
    CO_T = C_out // TCO

    # --- tiny f32 glue: modulation / demodulation --------------------------
    mod = scale * (style.astype(jnp.float32) @ mod_w.T.astype(jnp.float32)
                   + mod_b.astype(jnp.float32)[None, :])              # (B, C_in)
    w32 = weight.astype(jnp.float32)
    if demodulate:
        si = style_inv.reshape(1, C_in, 1, 1).astype(jnp.float32)
        demod = lax.rsqrt(jnp.sum((scale * si * w32) ** 2, axis=(1, 2, 3)) + 1e-8)
    else:
        demod = jnp.ones((C_out,), jnp.float32)

    # Weight: OIHW -> (C_out, K, K, C_in) -> (C_out, K*K*C_in); fold demod (f32).
    w_flat = jnp.transpose(w32, (0, 2, 3, 1)).reshape(C_out, KKC) * demod[:, None]
    # Modulation tiled over taps so column (tap*C_in + ci) multiplies channel ci.
    mod_full = jnp.tile(mod, (1, K * K)).reshape(B, 1, KKC)

    # --- layout plumbing: cast bf16 FIRST, then pad + flatten spatial ------
    x_bf = x_nchw.astype(jnp.bfloat16)
    x_pad = jnp.pad(x_bf, ((0, 0), (0, 0), (p, p), (p, p + (Wrow - Wp))))  # (B,C_in,Hp,Wrow)
    x_flat = x_pad.reshape(B, C_in, Hp * Wrow)
    x_flat = jnp.pad(x_flat, ((0, 0), (0, 0), (0, Lflat - Hp * Wrow)))     # tap-slice slack

    kernel = functools.partial(_modconv_kernel, K=K, C_in=C_in, Wrow=Wrow,
                               n_flat=n_flat, use_im2col=use_im2col)
    scratch = (pltpu.VMEM((KKC, n_flat), jnp.bfloat16) if use_im2col
               else pltpu.VMEM((TCO, n_flat), jnp.float32))

    flops = 2 * B * H * W * K * K * C_in * C_out
    bytes_accessed = (B * C_in * Lflat * 2           # bf16 input, once per sample
                      + B * C_out * KKC * 4          # f32 weight tiles
                      + B * KKC * 4                  # modulation vectors
                      + B * C_out * n_flat * out_itemsize)   # output slabs

    out_flat = pl.pallas_call(
        kernel,
        out_shape=jax.ShapeDtypeStruct((B, C_out, n_flat), out_dtype),
        grid=(B, CO_T),
        in_specs=[
            pl.BlockSpec((1, C_in, Lflat), lambda b, co: (b, 0, 0)),   # resident across co
            pl.BlockSpec((TCO, KKC), lambda b, co: (co, 0)),
            pl.BlockSpec((1, 1, KKC), lambda b, co: (b, 0, 0)),
        ],
        out_specs=pl.BlockSpec((1, TCO, n_flat), lambda b, co: (b, co, 0)),
        scratch_shapes=[scratch],
        compiler_params=pltpu.CompilerParams(
            dimension_semantics=("parallel", "arbitrary"),
            vmem_limit_bytes=vmem_limit),
        cost_estimate=pl.CostEstimate(flops=flops, transcendentals=0,
                                      bytes_accessed=bytes_accessed),
    )(x_flat, w_flat, mod_full)

    # (B, C_out, H*Wrow) -> (B, C_out, H, Wrow) is a free view; drop pad columns.
    out = out_flat.reshape(B, C_out, H, Wrow)[..., :W]
    return out


def _reference(x_nchw, style, weight, mod_w, mod_b, style_inv, demodulate=True):
    """Pure-JAX (f32) reference mirroring the PyTorch forward exactly."""
    B, C_in, H, W = x_nchw.shape
    C_out, _, K, _ = weight.shape
    scale = 1.0 / math.sqrt(C_in * K * K)
    pad = K // 2

    mod = (scale * (style @ mod_w.T + mod_b[None, :])).reshape(B, C_in, 1, 1)
    xm = mod * x_nchw
    out = lax.conv_general_dilated(
        xm, weight, window_strides=(1, 1),
        padding=((pad, pad), (pad, pad)),
        dimension_numbers=("NCHW", "OIHW", "NCHW"))
    if demodulate:
        si = style_inv.reshape(1, C_in, 1, 1)
        demod = lax.rsqrt(
            jnp.sum((scale * si * weight) ** 2, axis=(1, 2, 3)) + 1e-8)
        out = out * demod.reshape(1, C_out, 1, 1)
    return out


if __name__ == "__main__":
    # Module hyperparameters (small, consistent with the PyTorch __init__).
    B, C_in, C_out, H, W = 2, 4, 16, 16, 16
    style_dim, K = 16, 3

    key = jax.random.PRNGKey(0)
    k_w, k_mw, k_si, k_x, k_s = jax.random.split(key, 5)

    # Deterministic parameter init (matching the torch module's shapes).
    weight = jax.random.normal(k_w, (C_out, C_in, K, K), jnp.float32)        # nn.Parameter
    mod_w = jax.random.normal(k_mw, (C_in, style_dim), jnp.float32) * 0.1    # Linear.weight
    mod_b = jnp.ones((C_in,), jnp.float32)                                   # Linear.bias = 1.0
    style_inv = jax.random.normal(k_si, (1, 1, C_in, 1, 1), jnp.float32)     # buffer

    # Example inputs.
    x = jax.random.normal(k_x, (B, C_in, H, W), jnp.float32)
    style = jax.random.normal(k_s, (B, style_dim), jnp.float32)

    ref = _reference(x, style, weight, mod_w, mod_b, style_inv, demodulate=True)

    # Path 1: im2col single-matmul kernel, C_out split into 2 tiles (grid (2, 2)).
    out1 = modulated_conv2d(x, style, weight, mod_w, mod_b, style_inv,
                            demodulate=True, use_im2col=True, co_tile=8)
    out1 = jax.block_until_ready(out1).astype(jnp.float32)

    # Path 2: per-tap matmuls with the VMEM f32 accumulator (grid (2, 1)).
    out2 = modulated_conv2d(x, style, weight, mod_w, mod_b, style_inv,
                            demodulate=True, use_im2col=False)
    out2 = jax.block_until_ready(out2).astype(jnp.float32)

    for name, out in (("im2col", out1), ("per-tap", out2)):
        assert out.shape == (B, C_out, H, W)
        err = float(jnp.max(jnp.abs(out - ref)))
        # bf16 MXU operands + bf16 output vs. the f32 reference => ~1e-2..5e-2
        # worst-case abs error at these magnitudes; structural bugs would be O(1).
        assert jnp.allclose(out, ref, atol=1e-1, rtol=5e-2), (
            f"{name} path mismatch vs reference: max abs err = {err}")

    print("KERNEL_OK")
</pallas_src>

<mosaic_0001>
module attributes {stable_mosaic.version = 11 : i64} {
  func.func @_modconv_kernel(%arg0: i32, %arg1: i32, %arg2: memref<1x4x640xbf16, #tpu.memory_space<vmem>>, %arg3: memref<8x36xf32, #tpu.memory_space<vmem>>, %arg4: memref<1x1x36xf32, #tpu.memory_space<vmem>>, %arg5: memref<1x8x512xbf16, #tpu.memory_space<vmem>>, %arg6: memref<36x512xbf16, #tpu.memory_space<vmem>>) attributes {dimension_semantics = [#tpu.dimension_semantics<parallel>, #tpu.dimension_semantics<arbitrary>], iteration_bounds = array<i64: 2, 2>, scalar_prefetch = 0 : i64, scratch_operands = 1 : i64, tpu.core_type = #tpu.core_type<tc>, window_params = [{transform_indices = @transform_0, window_bounds = array<i64: 1, 4, 640>}, {transform_indices = @transform_1, window_bounds = array<i64: 8, 36>}, {transform_indices = @transform_2, window_bounds = array<i64: 1, 1, 36>}, {transform_indices = @transform_3, window_bounds = array<i64: 1, 8, 512>}]} {
    %c0 = arith.constant 0 : index
    %c0_0 = arith.constant 0 : index
    %0 = vector.load %arg3[%c0, %c0_0] : memref<8x36xf32, #tpu.memory_space<vmem>>, vector<8x36xf32>
    %c0_1 = arith.constant 0 : index
    %c0_2 = arith.constant 0 : index
    %c0_3 = arith.constant 0 : index
    %1 = vector.load %arg4[%c0_1, %c0_2, %c0_3] : memref<1x1x36xf32, #tpu.memory_space<vmem>>, vector<1x1x36xf32>
    %2 = vector.shape_cast %1 : vector<1x1x36xf32> to vector<36xf32>
    %3 = vector.shape_cast %2 : vector<36xf32> to vector<1x36xf32>
    %4 = vector.broadcast %3 : vector<1x36xf32> to vector<8x36xf32>
    %5 = arith.mulf %0, %4 : vector<8x36xf32>
    %6 = arith.truncf %5 : vector<8x36xf32> to vector<8x36xbf16>
    %c0_i32 = arith.constant 0 : i32
    %7 = arith.cmpi eq, %arg1, %c0_i32 : i32
    %8 = arith.extui %7 : i1 to i32
    %c0_i32_4 = arith.constant 0 : i32
    %9 = arith.cmpi ne, %8, %c0_i32_4 : i32
    scf.if %9 {
      %c0_10 = arith.constant 0 : index
      %c0_11 = arith.constant 0 : index
      %c0_12 = arith.constant 0 : index
      %16 = vector.load %arg2[%c0_10, %c0_11, %c0_12] : memref<1x4x640xbf16, #tpu.memory_space<vmem>>, vector<1x4x512xbf16>
      %17 = vector.shape_cast %16 : vector<1x4x512xbf16> to vector<4x512xbf16>
      %c0_13 = arith.constant 0 : index
      %c0_14 = arith.constant 0 : index
      %18 = vector.load %arg6[%c0_13, %c0_14] : memref<36x512xbf16, #tpu.memory_space<vmem>>, vector<4x512xbf16>
      tpu.vector_store %arg6[%c0_13, %c0_14], %17 {strides = array<i32>} : memref<36x512xbf16, #tpu.memory_space<vmem>>, vector<4x512xbf16>,
      %c0_15 = arith.constant 0 : index
      %c0_16 = arith.constant 0 : index
      %c1 = arith.constant 1 : index
      %19 = vector.load %arg2[%c0_15, %c0_16, %c1] : memref<1x4x640xbf16, #tpu.memory_space<vmem>>, vector<1x4x512xbf16>
      %20 = vector.shape_cast %19 : vector<1x4x512xbf16> to vector<4x512xbf16>
      %c4 = arith.constant 4 : index
      %c0_17 = arith.constant 0 : index
      %21 = vector.load %arg6[%c4, %c0_17] : memref<36x512xbf16, #tpu.memory_space<vmem>>, vector<4x512xbf16>
      tpu.vector_store %arg6[%c4, %c0_17], %20 {strides = array<i32>} : memref<36x512xbf16, #tpu.memory_space<vmem>>, vector<4x512xbf16>,
      %c0_18 = arith.constant 0 : index
      %c0_19 = arith.constant 0 : index
      %c2 = arith.constant 2 : index
      %22 = vector.load %arg2[%c0_18, %c0_19, %c2] : memref<1x4x640xbf16, #tpu.memory_space<vmem>>, vector<1x4x512xbf16>
      %23 = vector.shape_cast %22 : vector<1x4x512xbf16> to vector<4x512xbf16>
      %c8 = arith.constant 8 : index
      %c0_20 = arith.constant 0 : index
      %24 = vector.load %arg6[%c8, %c0_20] : memref<36x512xbf16, #tpu.memory_space<vmem>>, vector<4x512xbf16>
      tpu.vector_store %arg6[%c8, %c0_20], %23 {strides = array<i32>} : memref<36x512xbf16, #tpu.memory_space<vmem>>, vector<4x512xbf16>,
      %c0_21 = arith.constant 0 : index
      %c0_22 = arith.constant 0 : index
      %c32 = arith.constant 32 : index
      %25 = vector.load %arg2[%c0_21, %c0_22, %c32] : memref<1x4x640xbf16, #tpu.memory_space<vmem>>, vector<1x4x512xbf16>
      %26 = vector.shape_cast %25 : vector<1x4x512xbf16> to vector<4x512xbf16>
      %c12 = arith.constant 12 : index
      %c0_23 = arith.constant 0 : index
      %27 = vector.load %arg6[%c12, %c0_23] : memref<36x512xbf16, #tpu.memory_space<vmem>>, vector<4x512xbf16>
      tpu.vector_store %arg6[%c12, %c0_23], %26 {strides = array<i32>} : memref<36x512xbf16, #tpu.memory_space<vmem>>, vector<4x512xbf16>,
      %c0_24 = arith.constant 0 : index
      %c0_25 = arith.constant 0 : index
      %c33 = arith.constant 33 : index
      %28 = vector.load %arg2[%c0_24, %c0_25, %c33] : memref<1x4x640xbf16, #tpu.memory_space<vmem>>, vector<1x4x512xbf16>
      %29 = vector.shape_cast %28 : vector<1x4x512xbf16> to vector<4x512xbf16>
      %c16 = arith.constant 16 : index
      %c0_26 = arith.constant 0 : index
      %30 = vector.load %arg6[%c16, %c0_26] : memref<36x512xbf16, #tpu.memory_space<vmem>>, vector<4x512xbf16>
      tpu.vector_store %arg6[%c16, %c0_26], %29 {strides = array<i32>} : memref<36x512xbf16, #tpu.memory_space<vmem>>, vector<4x512xbf16>,
      %c0_27 = arith.constant 0 : index
      %c0_28 = arith.constant 0 : index
      %c34 = arith.constant 34 : index
      %31 = vector.load %arg2[%c0_27, %c0_28, %c34] : memref<1x4x640xbf16, #tpu.memory_space<vmem>>, vector<1x4x512xbf16>
      %32 = vector.shape_cast %31 : vector<1x4x512xbf16> to vector<4x512xbf16>
      %c20 = arith.constant 20 : index
      %c0_29 = arith.constant 0 : index
      %33 = vector.load %arg6[%c20, %c0_29] : memref<36x512xbf16, #tpu.memory_space<vmem>>, vector<4x512xbf16>
      tpu.vector_store %arg6[%c20, %c0_29], %32 {strides = array<i32>} : memref<36x512xbf16, #tpu.memory_space<vmem>>, vector<4x512xbf16>,
      %c0_30 = arith.constant 0 : index
      %c0_31 = arith.constant 0 : index
      %c64 = arith.constant 64 : index
      %34 = vector.load %arg2[%c0_30, %c0_31, %c64] : memref<1x4x640xbf16, #tpu.memory_space<vmem>>, vector<1x4x512xbf16>
      %35 = vector.shape_cast %34 : vector<1x4x512xbf16> to vector<4x512xbf16>
      %c24 = arith.constant 24 : index
      %c0_32 = arith.constant 0 : index
      %36 = vector.load %arg6[%c24, %c0_32] : memref<36x512xbf16, #tpu.memory_space<vmem>>, vector<4x512xbf16>
      tpu.vector_store %arg6[%c24, %c0_32], %35 {strides = array<i32>} : memref<36x512xbf16, #tpu.memory_space<vmem>>, vector<4x512xbf16>,
      %c0_33 = arith.constant 0 : index
      %c0_34 = arith.constant 0 : index
      %c65 = arith.constant 65 : index
      %37 = vector.load %arg2[%c0_33, %c0_34, %c65] : memref<1x4x640xbf16, #tpu.memory_space<vmem>>, vector<1x4x512xbf16>
      %38 = vector.shape_cast %37 : vector<1x4x512xbf16> to vector<4x512xbf16>
      %c28 = arith.constant 28 : index
      %c0_35 = arith.constant 0 : index
      %39 = vector.load %arg6[%c28, %c0_35] : memref<36x512xbf16, #tpu.memory_space<vmem>>, vector<4x512xbf16>
      tpu.vector_store %arg6[%c28, %c0_35], %38 {strides = array<i32>} : memref<36x512xbf16, #tpu.memory_space<vmem>>, vector<4x512xbf16>,
      %c0_36 = arith.constant 0 : index
      %c0_37 = arith.constant 0 : index
      %c66 = arith.constant 66 : index
      %40 = vector.load %arg2[%c0_36, %c0_37, %c66] : memref<1x4x640xbf16, #tpu.memory_space<vmem>>, vector<1x4x512xbf16>
      %41 = vector.shape_cast %40 : vector<1x4x512xbf16> to vector<4x512xbf16>
      %c32_38 = arith.constant 32 : index
      %c0_39 = arith.constant 0 : index
      %42 = vector.load %arg6[%c32_38, %c0_39] : memref<36x512xbf16, #tpu.memory_space<vmem>>, vector<4x512xbf16>
      tpu.vector_store %arg6[%c32_38, %c0_39], %41 {strides = array<i32>} : memref<36x512xbf16, #tpu.memory_space<vmem>>, vector<4x512xbf16>,
    } else {
    }
    %c0_5 = arith.constant 0 : index
    %c0_6 = arith.constant 0 : index
    %10 = vector.load %arg6[%c0_5, %c0_6] : memref<36x512xbf16, #tpu.memory_space<vmem>>, vector<36x512xbf16>
    %cst = arith.constant dense<0.000000e+00> : vector<8x512xf32>
    %11 = tpu.matmul %6, %10, %cst {dimension_numbers = #tpu.dot_dimension_numbers<[1], [0], [0], [1], [0, 0, 1, 1], [], []>} : vector<8x36xbf16>, vector<36x512xbf16>, vector<8x512xf32> -> vector<8x512xf32>
    %12 = arith.truncf %11 : vector<8x512xf32> to vector<8x512xbf16>
    %c0_7 = arith.constant 0 : index
    %c0_8 = arith.constant 0 : index
    %c0_9 = arith.constant 0 : index
    %13 = vector.load %arg5[%c0_7, %c0_8, %c0_9] : memref<1x8x512xbf16, #tpu.memory_space<vmem>>, vector<1x8x512xbf16>
    %14 = vector.shape_cast %13 : vector<1x8x512xbf16> to vector<8x512xbf16>
    %15 = vector.shape_cast %12 : vector<8x512xbf16> to vector<1x8x512xbf16>
    tpu.vector_store %arg5[%c0_7, %c0_8, %c0_9], %15 {strides = array<i32>} : memref<1x8x512xbf16, #tpu.memory_space<vmem>>, vector<1x8x512xbf16>,
    return
  }
  func.func @transform_0(%arg0: i32, %arg1: i32) -> (i32, i32, i32) {
    %c0_i32 = arith.constant 0 : i32
    %c0_i32_0 = arith.constant 0 : i32
    %c0_i32_1 = arith.constant 0 : i32
    return %arg0, %c0_i32, %c0_i32_0 : i32, i32, i32
  }
  func.func @transform_1(%arg0: i32, %arg1: i32) -> (i32, i32) {
    %c0_i32 = arith.constant 0 : i32
    %c0_i32_0 = arith.constant 0 : i32
    return %arg1, %c0_i32 : i32, i32
  }
  func.func @transform_2(%arg0: i32, %arg1: i32) -> (i32, i32, i32) {
    %c0_i32 = arith.constant 0 : i32
    %c0_i32_0 = arith.constant 0 : i32
    %c0_i32_1 = arith.constant 0 : i32
    return %arg0, %c0_i32, %c0_i32_0 : i32, i32, i32
  }
  func.func @transform_3(%arg0: i32, %arg1: i32) -> (i32, i32, i32) {
    %c0_i32 = arith.constant 0 : i32
    %c0_i32_0 = arith.constant 0 : i32
    return %arg0, %arg1, %c0_i32 : i32, i32, i32
  }
}

</mosaic_0001>

<bundles_post_ra>
// kernel: tpu_custom_call.1
= control target key start
LH: loop header
LB: loop body
LE: loop exit
PB: predicated region body
PF: predicated region fallthrough
CT: control target
= control target key end

     0   :  { %s1732_s0 = inlined_call_operand.hbm [shape: bf16[2,4,640], index: 0, kind: input, shape index: {}]   ;;  %s1733_s1 = inlined_call_operand.hbm [shape: f32[16,36], index: 1, kind: input, shape index: {}]   ;;  %s1734_s2 = inlined_call_operand.vmem [shape: f32[2,1,36], index: 2, kind: input, shape index: {}]   ;;  %s1735_s3 = inlined_call_operand.hbm [shape: bf16[2,16,512], index: 3, kind: output, shape index: {}]  }
   0x1   :  { %1743 = sst [smem:[#allocation17_spill]] %s1732_s0 }
   0x2   :  { %1744 = sst [smem:[#allocation18_spill]] %s1735_s3 }
   0x3   :  { %8 = vsyncpa [#allocation4], 0 }
   0x4   :  { %10 = vsyncpa [#allocation4 + $0x1], 0 }
   0x5   :  { %11 = vsyncpa [#allocation7], 0 }
   0x6   :  { %13 = vsyncpa [#allocation7 + $0x1], 0 }
   0x7   :  { %14 = vsyncpa [#allocation5], 0 }
   0x8   :  { %16 = vsyncpa [#allocation5 + $0x1], 0  ;;  %s1404_s12 = smov 0   ;;  %s1406_s13 = smov 0  }
   0x9   :  { %s1408_s14 = smov 0   ;;  %s1410_s15 = smov 0  }
   0xa   :  { %s1412_s16 = smov 0   ;;  %s1414_s17 = smov 0  }
   0xb   :  { %s1416_s18 = smov 0   ;;  %s1418_s19 = smov 0  }
   0xc   :  { %s1420_s20 = smov 0   ;;  %s1422_s21 = smov 0  }
   0xd   :  { %s1424_s22 = smov 0   ;;  %s1426_s23 = smov 0  }
   0xe   :  { %s1428_s24 = smov 0   ;;  %s1430_s25 = smov 0  }
   0xf LB: > { %1745 = sst [smem:[#allocation12_spill]] %s1361_s23  ;;  %s955_s26 = sadd.s32 4294967295, %s1369_s25   ;;  %s1369_s25 = sphi %s1430_s25, %s22_s25   ;;  %s1365_s24 = sphi %s1428_s24, %s1771_s24   ;;  %s1361_s23 = sphi %s1426_s23, %s1770_s23   ;;  %s1357_s22 = sphi %s1424_s22, %s1769_s22   ;;  %s1353_s21 = sphi %s1422_s21, %s1768_s21   ;;  %s1349_s20 = sphi %s1420_s20, %s1780_s20   ;;  %s1345_s19 = sphi %s1418_s19, %s1779_s19   ;;  %s1341_s18 = sphi %s1416_s18, %s1778_s18   ;;  %s1337_s17 = sphi %s1414_s17, %s1777_s17   ;;  %s1333_s16 = sphi %s1412_s16, %s1776_s16   ;;  %s1329_s15 = sphi %s1410_s15, %s1775_s15   ;;  %s1325_s14 = sphi %s1408_s14, %s1774_s14   ;;  %s1321_s13 = sphi %s1406_s13, %s1773_s13   ;;  %s1317_s12 = sphi %s1404_s12, %s1772_s12  }
  0x10   : > { %1746 = sst [smem:[#allocation13_spill]] %s1365_s24  ;;  %p48_p0 = scmp.ne.s32.totalorder %s1349_s20, %s1345_s19 }
  0x11   : > { %p49_p1 = scmp.eq.s32.totalorder %s1369_s25, 0  ;;  %p54_p2 = scmp.ne.s32.totalorder %s1345_s19, %s1341_s18 }
  0x12   : > { %p1481_p3 = scmp.eq.s32.totalorder %s955_s26, 0  ;;  %p1736_p6 = scmp.lt.s32.totalorder %s1369_s25, 4 }
  0x13   : > { %p50_p4 = por %p49_p1, %p48_p0  ;;  %s158_s4 = sand.u32 1, %s1349_s20  }
  0x14   : > { %p1489_p5 = por %p1481_p3, %p54_p2  ;;  %s1000_s5 = smul.u32 160, %s1365_s24 }
  0x15   : > { %s999_s6 = smul.u32 10, %s158_s4  ;;  %s1749_s0 = sld [smem:[#allocation17_spill]] }
  0x16   : > { %p1501_p7 = pnand %p1736_p6, %p50_p4  ;;  %p962_p8 = scmp.ge.s32.totalorder %s1369_s25, 1 }
  0x17   : > { %s162_s11 = scalar_lea.vmem [#allocation3], %s999_s6  ;;  %p199_p9 = scmp.lt.s32.totalorder %s1369_s25, 5 }
  0x18   : > { %s170_s18 = sshll.u32 %s162_s11, 4  ;;  %s159_s28 = scalar_lea.sflag [#allocation4], %s158_s4  ;;  %s171_s18 = int_to_ptr.vmem [resolvable:$true] %s170_s18 }
  0x19   : > { %p1167_p10 = pneg %p1501_p7  ;;  %s1178_s27 = scalar_lea.vmem %s171_s18, 160 }
  0x1a   : > { %p1179_p11 = scmp.ne.s32.totalorder %s171_s18, %s1178_s27  ;;  %s1371_s7 = smov [#allocation3]  }
  0x1b   : > { %s168_s9 = scalar_lea.hbm %s1749_s0, %s1000_s5  ;;  %s1183_s5 = sshll.u32 %s1371_s7, 4  ;;  %s1184_s5 = int_to_ptr.vmem [resolvable:$false] %s1183_s5 }
  0x1c   : > { %p1181_p12 = pnand %p1179_p11, %p1167_p10  ;;  %s1185_s8 = scalar_lea.vmem %s1184_s5, 320 }
  0x1d   : > { %p1186_p0 = scmp.lt.s32.totalorder %s171_s18, %s1184_s5  ;;  %p1187_p2 = scmp.lt.s32.totalorder %s1185_s8, %s1178_s27 }
  0x1e   : > { %p1182_p13 = pneg %p1181_p12 }
  0x1f   : > { %p1188_p4 = por %p1187_p2, %p1186_p0 }
  0x21   : > { %p1189_p6 = pnand %p1188_p4, %p1182_p13 }
  0x23   : > { %1192 = shalt.err (!%p1189_p6)
}
  0x24   : > { %1011 = dma.hbm_to_vmem [thread:$0]  (!%p1501_p7), %s168_s9, 160, %s171_s18, %s159_s28  }
  0x25   : > { %p1513_p6 = scmp.eq.s32.totalorder %s955_s26, 3  ;;  %p1521_p10 = pnand %p962_p8, %p199_p9 }
  0x26   : > { %s956_s6 = sadd.s32 4294967294, %s1369_s25   ;;  %s31_s10 = sadd.s32 1, %s1361_s23 }
  0x27   : > { %p32_p11 = scmp.ge.s32.totalorder %s31_s10, 2  ;;  %s67_s28 = sadd.s32 1, %s1337_s17 }
  0x28   : > { %p74_p7 = scmp.ne.s32.totalorder %s1337_s17, %s1333_s16  ;;  %p80_p12 = scmp.ne.s32.totalorder %s1333_s16, %s1329_s15 }
  0x29   : > { %s1782_s10 = smov (%p32_p11, %s31_s10), 0  ;;  %s1754_s26 = sadd.s32 1, %s1365_s24 }
  0x2a   : > { %1753 = sst [smem:[#allocation14_spill]] %s1782_s10  ;;  %s1784_s26 = smov (!%p32_p11, %s1754_s26), %s1365_s24 }
  0x2b   : > { %s64_s9 = ssub.s32 %s1361_s23, %s1782_s10  ;;  %s121_s11 = sadd.s32 1, %s1325_s14 }
  0x2c   : > { %p36_p8 = scmp.ge.s32.totalorder %s1784_s26, 2  ;;  %p65_p9 = scmp.eq.s32.totalorder %s64_s9, 0 }
  0x2d   : > { %p1542_p13 = por %p80_p12, %p1481_p3  ;;  %p131_p0 = scmp.ne.s32.totalorder %s1325_s14, %s1321_s13 }
  0x2e   : > { %s1786_s26 = smov (%p36_p8, %s1784_s26), 0  ;;  %p137_p11 = scmp.ne.s32.totalorder %s1321_s13, %s1317_s12 }
  0x2f   : > { %1756 = sst [smem:[#allocation15_spill]] %s1786_s26  ;;  %s38_s7 = ssub.s32 %s1365_s24, %s1786_s26 }
  0x30   : > { %s1551_s18 = scalar_select %p65_p9, %s1337_s17, %s67_s28  }
  0x31   : > { %p1557_p2 = por %p1513_p6, %p131_p0  ;;  %p39_p4 = scmp.eq.s32.totalorder %s38_s7, 0 }
  0x32   : > { %s118_s29 = sor.u32 %s64_s9, %s38_s7  ;;  %s1758_s8 = sadd.s32 1, %s1349_s20 }
  0x33   : > { %s1757_s5 = scalar_select %p1557_p2, 1, 0 }
  0x34   : > { %p119_p3 = scmp.eq.s32.totalorder %s118_s29, 0  ;;  %p138_p12 = scmp.eq.s32.totalorder %s956_s6, 3 }
  0x35   : > { %s1566_s0 = scalar_select %p39_p4, %s1349_s20, %s1758_s8  }
  0x36   : > { %s1569_s10 = scalar_select %p119_p3, %s1325_s14, %s121_s11  }
  0x37   : > { %1759 = sst [smem:[#allocation16_spill]] %s1566_s0  ;;  %s177_s3 = sand.u32 1, %s1337_s17  }
  0x38   : > { %p76_p8 = por %p74_p7, %p49_p1  ;;  %s960_s27 = sshll.u32 %s177_s3, 3 }
  0x39   : > { %p1577_p6 = por %p138_p12, %p137_p11  ;;  %s961_s26 = sshll.u32 %s1361_s23, 7 }
  0x3a   : > { %s181_s24 = scalar_lea.vmem [#allocation6], %s960_s27  ;;  %s186_s8 = scalar_lea.hbm %s1733_s1, %s961_s26 }
  0x3b   : > { %s1760_s28 = scalar_select %p1577_p6, 1, 0 }
  0x3c   : > { %s188_s9 = sshll.u32 %s181_s24, 4  ;;  %p1761_p9 = scmp.lt.s32.totalorder %s1369_s25, 4  ;;  %s189_s9 = int_to_ptr.vmem [resolvable:$true] %s188_s9 }
  0x3d   : > { %s178_s11 = scalar_lea.sflag [#allocation7], %s177_s3  ;;  %s1206_s0 = scalar_lea.vmem %s189_s9, 128 }
  0x3e   : > { %p1587_p0 = pnand %p1761_p9, %p76_p8  ;;  %p1207_p7 = scmp.ne.s32.totalorder %s189_s9, %s1206_s0 }
  0x3f   : > { %s1372_s27 = smov [#allocation6]  }
  0x40   : > { %p1195_p1 = pneg %p1587_p0  ;;  %s1211_s24 = sshll.u32 %s1372_s27, 4  ;;  %s1212_s24 = int_to_ptr.vmem [resolvable:$false] %s1211_s24 }
  0x41   : > { %s1213_s23 = scalar_lea.vmem %s1212_s24, 256  ;;  %p1214_p11 = scmp.lt.s32.totalorder %s189_s9, %s1212_s24 }
  0x42   : > { %p1209_p4 = pnand %p1207_p7, %p1195_p1  ;;  %p1215_p12 = scmp.lt.s32.totalorder %s1213_s23, %s1206_s0 }
  0x44   : > { %p1210_p3 = pneg %p1209_p4  ;;  %p1216_p6 = por %p1215_p12, %p1214_p11 }
  0x46   : > { %p1217_p2 = pnand %p1216_p6, %p1210_p3 }
  0x48   : > { %1220 = shalt.err (!%p1217_p2)
}
  0x49   : > { %1014 = dma.hbm_to_vmem [thread:$0]  (!%p1587_p0), %s186_s8, 128, %s189_s9, %s178_s11  }
  0x4a   : > { %203 = sbr.rel (%p1521_p10) target bundleno = 499 (0x1f3), region = 32  ;;  %s205_s3 = sand.u32 (!%p1521_p10), 1, %s1345_s19  }
  0x4b   : > { %s1001_s26 = smul.u32 (!%p1521_p10), 10, %s205_s3  ;;  %s206_s7 = scalar_lea.sflag (!%p1521_p10), [#allocation4], %s205_s3 }
  0x4d   : > { %s1598_s29 = scalar_lea.vmem (!%p1521_p10), [#allocation3], %s1001_s26 }
  0x4f   : > { %1304 = dma.done.wait (%p1489_p5), %s206_s7, 160  }
  0x50   : > { %1306 = vsyncadd (%p1489_p5), %s206_s7, 4294967136  ;;  %s214_s0 = sand.u32 1, %s1333_s16  }
  0x51   : > { %s963_s23 = sshll.u32 %s214_s0, 3  ;;  %s215_s9 = scalar_lea.sflag [#allocation7], %s214_s0 }
  0x52   : > { %s218_s8 = scalar_lea.vmem [#allocation6], %s963_s23 }
  0x53   : > { %1308 = dma.done.wait (%p1542_p13), %s215_s9, 128  }
  0x54   : > { %1310 = vsyncadd (%p1542_p13), %s215_s9, 4294967168  ;;  %p249_p10 = scmp.lt.s32.totalorder %s1357_s22, 1  ;;  %s246_s4 = sand.u32 1, %s1321_s13   ;;  %v253_v0 = vld [vmem:[%s218_s8] sm:$0xff] }
  0x55   : > { %s964_s30 = sshll.u32 %s246_s4, 4  ;;  %p966_p5 = scmp.ne.s32.totalorder %s1353_s21, 0 }
  0x56   : > { %s250_s6 = scalar_select %p249_p10, %s1357_s22, 1 }
  0x57   : > { %s1619_s15 = scalar_lea.vmem [#allocation8], %s964_s30  ;;  %s1373_s3 = smov (!%p966_p5), 126  }
  0x58   : > { %s251_s24 = scalar_lea.vmem %s1734_s2, %s250_s6  ;;  %266 = sbr.rel (%p966_p5) target bundleno = 267 (0x10b), region = 44 }
  0x59   : > { %v965_v1 = vld [vmem:[%s251_s24] ss:$0 sm:$0xff]  ;;  %s1375_s26 = smov (!%p966_p5), 127   ;;  %s1376_s7 = smov (!%p966_p5), 96  }
  0x5a   : > { %v261_v2 = vmul.f32 %v965_v1, %v253_v0  ;;  %s1377_s0 = smov (!%p966_p5), 95   ;;  %s1378_s23 = smov (!%p966_p5), 94  }
  0x5b   : > { %s1379_s9 = smov (!%p966_p5), 64   ;;  %s1380_s8 = smov (!%p966_p5), 63  }
  0x5c   : > { %v1617_v3 = vpack.c.bf16 %v261_v2, %v261_v2  ;;  %s1381_s30 = smov (!%p966_p5), 62  }
  0x5d   : > { %v969_v4 = vld.sshfl [vmem:[%s1598_s29 + $0x8] sm:$0x3 pattern:$0x76325410]  ;;  %v288_v5 = vld [vmem:[%s1598_s29] sm:$0xff]  ;;  %v296_v6 = vlaneseq  ;;  %vm324_vm0 = vcmask 1043456  }
  0x5e   : > { %364 = vrot.lane.b32.xlu1 %v969_v4, %s1373_s3  ;;  %v338_v7 = vcombine.high %v288_v5, %v288_v5  ;;  %967 = vst.sshfl [vmem:[#allocation2] sm:$0xf pattern:$0x76325410] %v288_v5  ;;  %v1374_v8 = vmov 1983009808   ;;  %v292_v11 = vcombine.low %v288_v5, %v288_v5 }
  0x5f   : > { %v294_v9 = vunpack.c.l.s4 %v1374_v8  ;;  %v297_v10 = vshrl.u32 %v296_v6, 7  ;;  %v1144_v13 = vld [vmem:[%s1598_s29 + $0x8] ss:$0 sps:$4 sm:$0x33]   ;;  %vm326_vm1 = vcmask 1039360   ;;  %vm370_vm2 = vcmask 1031168  }
  0x60   : > { %968 = vst.sshfl [vmem:[#allocation2 + $0x8] sm:$0xf pattern:$0x76325410] %v338_v7  ;;  %vm415_vm3 = vcmask 785408   ;;  %vm459_vm4 = vcmask 777216  }
  0x61   : > { %v295_v12 = vunpack.c.0.s8 %v294_v9  ;;  %v1146_v19 = vld [vmem:[%s1598_s29 + $0x8] ss:$0 sps:$4 sm:$0x33]   ;;  %vm504_vm5 = vcmask 769024   ;;  %vm548_vm6 = vcmask 523264   ;;  %vm593_vm7 = vcmask 515072  }
  0x62   : > { %v1147_v21 = vld [vmem:[%s1598_s29 + $0x8] ss:$0 sps:$4 sm:$0x33]   ;;  %vm637_vm8 = vcmask 506880  }
  0x63   : > { %v298_v14 = vsub.s32 %v295_v12, %v297_v10  ;;  %v1148_v23 = vld [vmem:[%s1598_s29 + $0x8] ss:$0 sps:$4 sm:$0x33]  }
  0x65   : > { %v299_v15 = vrot.slane %v292_v11, %v298_v14  ;;  %v314_v16 = vrot.slane %v1144_v13, %v298_v14  ;;  %v306_v17 = vrot.slane %v288_v5, %v298_v14  ;;  %v352_v18 = vrot.slane %v338_v7, %v298_v14 }
  0x66   : > { %v404_v20 = vrot.slane %v1146_v19, %v298_v14  ;;  %v493_v22 = vrot.slane %v1147_v21, %v298_v14  ;;  %v582_v24 = vrot.slane %v1148_v23, %v298_v14 }
  0x67   : > { %315 = vrot.lane.b32.xlu0 %v299_v15, %s1375_s26  ;;  %319 = vrot.lane.b32.xlu1 %v314_v16, %s1375_s26 }
  0x6b   : > { %317 = vrot.lane.b32.xlu0 %v306_v17, %s1375_s26  ;;  %360 = vrot.lane.b32.xlu1 %v306_v17, %s1373_s3 }
  0x6f   : > { %362 = vrot.lane.b32.xlu0 %v352_v18, %s1373_s3  ;;  %407 = vrot.lane.b32.xlu1 %v306_v17, %s1376_s7 }
  0x73   : > { %405 = vrot.lane.b32.xlu0 %v299_v15, %s1376_s7  ;;  %449 = vrot.lane.b32.xlu1 %v306_v17, %s1377_s0 }
  0x77   : > { %409 = vrot.lane.b32.xlu0 %v404_v20, %s1376_s7  ;;  %453 = vrot.lane.b32.xlu1 %v969_v4, %s1377_s0 }
  0x7b   : > { %451 = vrot.lane.b32.xlu0 %v352_v18, %s1377_s0  ;;  %496 = vrot.lane.b32.xlu1 %v306_v17, %s1378_s23 }
  0x7f   : > { %494 = vrot.lane.b32.xlu0 %v299_v15, %s1378_s23  ;;  %538 = vrot.lane.b32.xlu1 %v306_v17, %s1379_s9 }
  0x83   : > { %498 = vrot.lane.b32.xlu0 %v493_v22, %s1378_s23  ;;  %542 = vrot.lane.b32.xlu1 %v969_v4, %s1379_s9 }
  0x87   : > { %540 = vrot.lane.b32.xlu0 %v352_v18, %s1379_s9  ;;  %585 = vrot.lane.b32.xlu1 %v306_v17, %s1380_s8 }
  0x8b   : > { %583 = vrot.lane.b32.xlu0 %v299_v15, %s1380_s8  ;;  %627 = vrot.lane.b32.xlu1 %v306_v17, %s1381_s30 }
  0x8f   : > { %587 = vrot.lane.b32.xlu0 %v582_v24, %s1380_s8  ;;  %631 = vrot.lane.b32.xlu1 %v969_v4, %s1381_s30 }
  0x93   : > { %629 = vrot.lane.b32.xlu0 %v352_v18, %s1381_s30 }
  0xd0   : > { %v365_v25 = vpop.permute.xlu1 %364 }
  0xd1   : > { %v368_v40 = vrot.slane %v365_v25, 4 }
  0xd9   : > { %v316_v26 = vpop.permute.xlu0 %315  ;;  %v320_v27 = vpop.permute.xlu1 %319 }
  0xda   : > { %v323_v28 = vrot.slane %v320_v27, 4  ;;  %v321_v31 = vrot.slane %v316_v26, 4 }
  0xdd   : > { %v318_v29 = vpop.permute.xlu0 %317  ;;  %v361_v30 = vpop.permute.xlu1 %360 }
  0xde   : > { %v322_v32 = vrot.slane %v318_v29, 4  ;;  %v366_v35 = vrot.slane %v361_v30, 4 }
  0xe0   : > { %v325_v33 = vsel %vm324_vm0, %v321_v31, %v322_v32  ;;  %v328_v34 = vsel %vm324_vm0, %v322_v32, %v323_v28 }
  0xe1   : > { %v327_v36 = vsel %vm326_vm1, %v316_v26, %v325_v33  ;;  %v329_v37 = vsel %vm326_vm1, %v318_v29, %v328_v34  ;;  %v363_v38 = vpop.permute.xlu0 %362  ;;  %v408_v39 = vpop.permute.xlu1 %407 }
  0xe2   : > { %332 = vst [vmem:[#allocation2] sm:$0xcc] %v327_v36  ;;  %333 = vst [vmem:[#allocation2 + $0x8] sm:$0xcc] %v329_v37  ;;  %v367_v41 = vrot.slane %v363_v38, 4  ;;  %v412_v44 = vrot.slane %v408_v39, 4 }
  0xe4   : > { %v369_v42 = vsel %vm324_vm0, %v366_v35, %v367_v41  ;;  %v372_v43 = vsel %vm324_vm0, %v367_v41, %v368_v40 }
  0xe5   : > { %v371_v45 = vsel %vm370_vm2, %v361_v30, %v369_v42  ;;  %v373_v46 = vsel %vm370_vm2, %v363_v38, %v372_v43  ;;  %v406_v47 = vpop.permute.xlu0 %405  ;;  %v450_v48 = vpop.permute.xlu1 %449 }
  0xe6   : > { %376 = vst [vmem:[#allocation2 + $0x10] sm:$0x33] %v371_v45  ;;  %377 = vst [vmem:[#allocation2 + $0x18] sm:$0x33] %v373_v46  ;;  %v411_v49 = vrot.slane %v406_v47, 4  ;;  %v455_v60 = vrot.slane %v450_v48, 4 }
  0xe8   : > { %v414_v50 = vsel %vm324_vm0, %v411_v49, %v412_v44 }
  0xe9   : > { %v416_v51 = vsel %vm415_vm3, %v406_v47, %v414_v50  ;;  %v410_v52 = vpop.permute.xlu0 %409  ;;  %v454_v53 = vpop.permute.xlu1 %453 }
  0xea   : > { %421 = vst [vmem:[#allocation2 + $0x10] sm:$0xcc] %v416_v51  ;;  %v413_v54 = vrot.slane %v410_v52, 4  ;;  %v457_v56 = vrot.slane %v454_v53, 4 }
  0xec   : > { %v417_v55 = vsel %vm324_vm0, %v412_v44, %v413_v54 }
  0xed   : > { %v418_v57 = vsel %vm415_vm3, %v408_v39, %v417_v55  ;;  %v452_v58 = vpop.permute.xlu0 %451  ;;  %v497_v59 = vpop.permute.xlu1 %496 }
  0xee   : > { %422 = vst [vmem:[#allocation2 + $0x18] sm:$0xcc] %v418_v57  ;;  %v456_v61 = vrot.slane %v452_v58, 4  ;;  %v501_v0 = vrot.slane %v497_v59, 4 }
  0xf0   : > { %v458_v62 = vsel %vm324_vm0, %v455_v60, %v456_v61  ;;  %v461_v63 = vsel %vm324_vm0, %v456_v61, %v457_v56 }
  0xf1   : > { %v460_v1 = vsel %vm459_vm4, %v450_v48, %v458_v62  ;;  %v462_v2 = vsel %vm459_vm4, %v452_v58, %v461_v63  ;;  %v495_v4 = vpop.permute.xlu0 %494  ;;  %v539_v5 = vpop.permute.xlu1 %538 }
  0xf2   : > { %465 = vst [vmem:[#allocation2 + $0x20] sm:$0x33] %v460_v1  ;;  %466 = vst [vmem:[#allocation2 + $0x28] sm:$0x33] %v462_v2  ;;  %v500_v6 = vrot.slane %v495_v4, 4  ;;  %v544_v17 = vrot.slane %v539_v5, 4 }
  0xf4   : > { %v503_v7 = vsel %vm324_vm0, %v500_v6, %v501_v0 }
  0xf5   : > { %v505_v8 = vsel %vm504_vm5, %v495_v4, %v503_v7  ;;  %v499_v9 = vpop.permute.xlu0 %498  ;;  %v543_v10 = vpop.permute.xlu1 %542 }
  0xf6   : > { %510 = vst [vmem:[#allocation2 + $0x20] sm:$0xcc] %v505_v8  ;;  %v502_v11 = vrot.slane %v499_v9, 4  ;;  %v546_v13 = vrot.slane %v543_v10, 4 }
  0xf8   : > { %v506_v12 = vsel %vm324_vm0, %v501_v0, %v502_v11 }
  0xf9   : > { %v507_v14 = vsel %vm504_vm5, %v497_v59, %v506_v12  ;;  %v541_v15 = vpop.permute.xlu0 %540  ;;  %v586_v16 = vpop.permute.xlu1 %585 }
  0xfa   : > { %511 = vst [vmem:[#allocation2 + $0x28] sm:$0xcc] %v507_v14  ;;  %v545_v18 = vrot.slane %v541_v15, 4  ;;  %v590_v21 = vrot.slane %v586_v16, 4 }
  0xfc   : > { %v547_v19 = vsel %vm324_vm0, %v544_v17, %v545_v18  ;;  %v550_v20 = vsel %vm324_vm0, %v545_v18, %v546_v13 }
  0xfd   : > { %v549_v22 = vsel %vm548_vm6, %v539_v5, %v547_v19  ;;  %v551_v23 = vsel %vm548_vm6, %v541_v15, %v550_v20  ;;  %v584_v24 = vpop.permute.xlu0 %583  ;;  %v628_v25 = vpop.permute.xlu1 %627 }
  0xfe   : > { %554 = vst [vmem:[#allocation2 + $0x30] sm:$0x33] %v549_v22  ;;  %555 = vst [vmem:[#allocation2 + $0x38] sm:$0x33] %v551_v23  ;;  %v589_v26 = vrot.slane %v584_v24, 4  ;;  %v633_v36 = vrot.slane %v628_v25, 4 }
 0x100   : > { %v592_v27 = vsel %vm324_vm0, %v589_v26, %v590_v21 }
 0x101   : > { %v594_v28 = vsel %vm593_vm7, %v584_v24, %v592_v27  ;;  %v588_v29 = vpop.permute.xlu0 %587  ;;  %v632_v30 = vpop.permute.xlu1 %631 }
 0x102   : > { %599 = vst [vmem:[#allocation2 + $0x30] sm:$0xcc] %v594_v28  ;;  %v591_v31 = vrot.slane %v588_v29, 4  ;;  %v635_v33 = vrot.slane %v632_v30, 4 }
 0x104   : > { %v595_v32 = vsel %vm324_vm0, %v590_v21, %v591_v31 }
 0x105   : > { %v596_v34 = vsel %vm593_vm7, %v586_v16, %v595_v32  ;;  %v630_v35 = vpop.permute.xlu0 %629 }
 0x106   : > { %600 = vst [vmem:[#allocation2 + $0x38] sm:$0xcc] %v596_v34  ;;  %v634_v37 = vrot.slane %v630_v35, 4 }
 0x108   : > { %v636_v38 = vsel %vm324_vm0, %v633_v36, %v634_v37  ;;  %v639_v39 = vsel %vm324_vm0, %v634_v37, %v635_v33 }
 0x109   : > { %v638_v40 = vsel %vm637_vm8, %v628_v25, %v636_v38  ;;  %v640_v41 = vsel %vm637_vm8, %v630_v35, %v639_v39 }
 0x10a   : > { %643 = vst [vmem:[#allocation2 + $0x40] sm:$0x33] %v638_v40  ;;  %644 = vst [vmem:[#allocation2 + $0x48] sm:$0x33] %v640_v41 }
 0x10b PF: > { %vm709_vm9 = vcmask 1041408   ;;  %v1153_v48 = vld [vmem:[#allocation2 + $0x24] ss:$16 sps:$4 sm:$0xff]   ;;  %v1157_v50 = vld [vmem:[#allocation2 + $0x20] ss:$16 sps:$4 sm:$0xff]   ;;  %v1382_v56 = vmov 0  }
 0x10c   : > { %v1159_v54 = vld [vmem:[#allocation2 + $0x4] ss:$16 sps:$4 sm:$0xff]   ;;  %v1161_v55 = vld [vmem:[#allocation2 + $0xc] ss:$16 sps:$4 sm:$0xff]   ;;  %754 = vmatprep.mubr.bf16.mxu0 %v1382_v56  ;;  %795 = vmatprep.mubr.bf16.mxu1 %v1382_v56  ;;  %v1163_v57 = vld [vmem:[#allocation2] ss:$16 sps:$4 sm:$0xff]  }
 0x10d   : > { %v1155_v49 = vld [vmem:[#allocation2 + $0x2c] ss:$16 sps:$4 sm:$0xff]   ;;  %v1158_v53 = vld [vmem:[#allocation2 + $0x28] ss:$16 sps:$4 sm:$0xff]   ;;  %vm705_vm10 = vcmask 293888   ;;  %s992_s29 = sshll.u32 %s1353_s21, 2 }
 0x10e   : > { %v1164_v58 = vld [vmem:[#allocation2 + $0x8] ss:$16 sps:$4 sm:$0xff]   ;;  %s993_s6 = sshll.u32 %s1357_s22, 3  ;;  %s839_s24 = sshll.u32 %s1619_s15, 4  ;;  %s1654_s24 = int_to_ptr.vmem [resolvable:$true] %s839_s24 }
 0x10f   : > { %s835_s11 = sadd.s32 %s993_s6, %s992_s29  ;;  %s1763_s7 = sld [smem:[#allocation18_spill]] }
 0x110   : > { %s994_s27 = sshll.u32 %s835_s11, 6  ;;  %s823_s21 = scalar_lea.sflag [#allocation5], %s246_s4 }
 0x111   : > { %v653_v42 = vld [vmem:[#allocation2 + $0x40] sm:$0x33]  ;;  %v654_v43 = vld [vmem:[#allocation2 + $0x48] sm:$0x33]  ;;  %s1221_s22 = scalar_lea.vmem %s1654_s24, 256  ;;  %p1764_p2 = scmp.ne.s32.totalorder %s1757_s5, 0 }
 0x112   : > { %v982_v44 = vcombine.high %v653_v42, %v653_v42  ;;  %v984_v45 = vcombine.high %v654_v43, %v654_v43  ;;  %v981_v46 = vcombine.low %v653_v42, %v653_v42  ;;  %v983_v47 = vcombine.low %v654_v43, %v654_v43  ;;  %p1222_p13 = scmp.ne.s32.totalorder %s1654_s24, %s1221_s22  ;;  %s1383_s23 = smov [#allocation8]  }
 0x113   : > { %s1225_s9 = sshll.u32 %s1383_s23, 4  ;;  %s1226_s9 = int_to_ptr.vmem [resolvable:$false] %s1225_s9 }
 0x114   : > { %985 = vmatprep.subr.msk.bf16.mxu0 %vm709_vm9, %v982_v44  ;;  %987 = vmatprep.subr.msk.bf16.mxu1 %vm709_vm9, %v984_v45  ;;  %v711_v51 = vsel %vm709_vm9, %v981_v46, 0  ;;  %v717_v52 = vsel %vm709_vm9, %v983_v47, 0  ;;  %p1223_p8 = pnand %p1222_p13, %p1764_p2  ;;  %s1227_s8 = scalar_lea.vmem %s1226_s9, 512 }
 0x115   : > { %733 = vmatpush1.bf16.msra.mxu0 %v711_v51  ;;  %774 = vmatpush1.bf16.msra.mxu1 %v717_v52  ;;  %s1652_s0 = scalar_lea.hbm %s1763_s7, %s994_s27  ;;  %p1228_p9 = scmp.lt.s32.totalorder %s1654_s24, %s1226_s9 }
 0x116   : > { %734 = vmatprep.subr.bf16.mxu0 %v1153_v48  ;;  %775 = vmatprep.subr.bf16.mxu1 %v1155_v49  ;;  %p1224_p6 = pneg %p1223_p8  ;;  %p1229_p0 = scmp.lt.s32.totalorder %s1227_s8, %s1221_s22 }
 0x118   : > { %p1230_p1 = por %p1229_p0, %p1228_p9 }
 0x119   : > { %735 = vmatpush1.bf16.msra.mxu0 %v1157_v50  ;;  %776 = vmatpush1.bf16.msra.mxu1 %v1158_v53 }
 0x11a   : > { %736 = vmatprep.subr.bf16.mxu0 %v1159_v54  ;;  %777 = vmatprep.subr.bf16.mxu1 %v1161_v55  ;;  %p1231_p7 = pnand %p1230_p1, %p1224_p6 }
 0x11d   : > { %737 = vmatpush1.bf16.msra.mxu0 %v1163_v57  ;;  %778 = vmatpush1.bf16.msra.mxu1 %v1164_v58 }
 0x120   : > { %986 = vmatmul.mubr.msk.bf16.vlgmr.msra.gmra.mxu0 %vm705_vm10, %v1617_v3  ;;  %988 = vmatmul.mubr.msk.bf16.vlgmr.msra.gmra.mxu1 %vm705_vm10, %v1617_v3 }
 0x1e0   : > { %v756_v59 = vpop.f32.mrf.mxu0  ;;  %v797_v60 = vpop.f32.mrf.mxu1 }
 0x1e2   : > { %v758_v61 = vpop.f32.mrf.mxu0  ;;  %v799_v62 = vpop.f32.mrf.mxu1 }
 0x1e3   : > { %v997_v63 = vpack.c.bf16 %v758_v61, %v756_v59  ;;  %v998_v0 = vpack.c.bf16 %v799_v62, %v797_v60 }
 0x1e4   : > { %v760_v3 = vpop.f32.mrf.mxu0  ;;  %v801_v1 = vpop.f32.mrf.mxu1 }
 0x1e5   : > { %820 = vst [vmem:[%s1619_s15] sm:$0xff] %v997_v63  ;;  %821 = vst [vmem:[%s1619_s15 + $0x8] sm:$0xff] %v998_v0 }
 0x1e6   : > { %v761_v2 = vpop.f32.mrf.mxu0  ;;  %v802_v4 = vpop.f32.mrf.mxu1 }
 0x1e7   : > { %1234 = shalt.err (!%p1231_p7)
}
 0x1e8   : > { %s1235_s15 = scalar_lea.hbm %s1652_s0, 256  ;;  %s1239_s29 = scalar_lea.hbm %s1763_s7, 1024 }
 0x1e9   : > { %p1236_p4 = scmp.ne.s32.totalorder %s1652_s0, %s1235_s15  ;;  %p1240_p12 = scmp.lt.s32.totalorder %s1652_s0, %s1763_s7 }
 0x1ea   : > { %p1241_p10 = scmp.lt.s32.totalorder %s1239_s29, %s1235_s15 }
 0x1eb   : > { %p1237_p3 = pnand %p1236_p4, %p1764_p2 }
 0x1ec   : > { %p1242_p5 = por %p1241_p10, %p1240_p12 }
 0x1ed   : > { %p1238_p11 = pneg %p1237_p3 }
 0x1ef   : > { %p1243_p13 = pnand %p1242_p5, %p1238_p11 }
 0x1f1   : > { %1246 = shalt.err (!%p1243_p13)
}
 0x1f2   : > { %1006 = dma.vmem_to_hbm [thread:$0]  (%p1764_p2), %s1654_s24, 256, %s1652_s0, %s823_s21  }
 0x1f3 PF: > { %p1020_p8 = scmp.ge.s32.totalorder %s1369_s25, 2  ;;  %s851_s27 = sand.u32 1, %s1317_s12  }
 0x1f4   : > { %p1765_p6 = scmp.ne.s32.totalorder %s1760_s28, 0  ;;  %s852_s3 = scalar_lea.sflag [#allocation5], %s851_s27 }
 0x1f6   : > { %p1016_p9 = pnand %p1020_p8, %p1765_p6 }
 0x1f8   : > { %p1017_p0 = pneg %p1016_p9 }
 0x1fa   : > { %1312 = dma.done.wait (%p1017_p0), %s852_s3, 256  }
 0x1fb   : > { %1314 = vsyncadd (%p1017_p0), %s852_s3, 4294967040  ;;  %s22_s25 = sadd.s32 1, %s1369_s25   ;;  %s1767_s5 = sld [smem:[#allocation16_spill]] }
 0x1fc   : > { %p1685_p1 = scmp.ge.s32.totalorder %s22_s25, 6   ;;  %s1768_s21 = sld [smem:[#allocation12_spill]] }
 0x1fd   : > { %s1769_s22 = sld [smem:[#allocation13_spill]]  ;;  %s1772_s12 = smov %s1321_s13 }
 0x1fe   : > { %s1770_s23 = sld [smem:[#allocation14_spill]]  ;;  %s1773_s13 = smov %s1325_s14 }
 0x1ff   : > { %s1771_s24 = sld [smem:[#allocation15_spill]]  ;;  %s1774_s14 = smov %s1569_s10 }
 0x200   : > { %s1775_s15 = smov %s1333_s16  ;;  %s1776_s16 = smov %s1337_s17 }
 0x201   : > { %s1777_s17 = smov %s1551_s18  ;;  %s1778_s18 = smov %s1345_s19 }
 0x202   : > { %s1779_s19 = smov %s1349_s20  ;;  %s1780_s20 = smov %s1767_s5 }
 0x203   :  { %21 = sbr.rel (!%p1685_p1) target bundleno = 15 (0xf), region = 97 }
 0x208   :  { %857 = vsyncpa [#allocation4], 1 }
 0x209   :  { %859 = vsyncpa [#allocation4 + $0x1], 1 }
 0x20a   :  { %860 = vsyncpa [#allocation7], 1 }
 0x20b   :  { %862 = vsyncpa [#allocation7 + $0x1], 1 }
 0x20c   :  { %863 = vsyncpa [#allocation5], 1 }
 0x20d   :  { %865 = vsyncpa [#allocation5 + $0x1], 1 }

</bundles_post_ra>
